<compile_context>
chip_gen: v7x
topology: tpu7x:2x2x1
jax: 0.10.0
libtpu: 0.0.40
codegen_flags: <defaults>
</compile_context>

<pallas_src>
import math
import functools

import jax
import jax.numpy as jnp
from jax import lax
from jax.experimental import pallas as pl
from jax.experimental.pallas import tpu as pltpu


# ---------------------------------------------------------------------------
# Stage 1: Q/K/V projection + RoPE (once per token).
# ---------------------------------------------------------------------------
def _proj_rope_kernel(x_ref, cos_ref, sin_ref,
                      wq_ref, bq_ref, wk_ref, bk_ref, wv_ref, bv_ref,
                      q_ref, k_ref, v_ref,
                      *, num_heads, head_dim):
  """x_ref: (1, ts, H) bf16; cos/sin_ref: (ts, head_dim//2) f32 (both halves of a
  head share the same cos/sin values); w*_ref: (H, H) bf16 residents (already
  transposed to (in, out), scale folded into Wq); b*_ref: (1, H) f32 residents;
  q/k/v_ref: (1, ts, H) bf16 outputs."""
  half = head_dim // 2
  x = x_ref[0]                                            # (ts, H) bf16
  cos = cos_ref[...]                                      # (ts, half) f32
  sin = sin_ref[...]                                      # (ts, half) f32

  q = jnp.dot(x, wq_ref[...], preferred_element_type=jnp.float32) + bq_ref[...]
  k = jnp.dot(x, wk_ref[...], preferred_element_type=jnp.float32) + bk_ref[...]
  v = jnp.dot(x, wv_ref[...], preferred_element_type=jnp.float32) + bv_ref[...]
  v_ref[0] = v.astype(v_ref.dtype)

  def rope_store(t, out_ref):
    # q_embed = t*cos + rotate_half(t)*sin, written half-by-half: pure VPU,
    # no MXU rot-matmul, no concatenate copies.  Runs once per token only.
    for h in range(num_heads):
      lo = h * head_dim
      a = t[:, lo:lo + half]                              # first half of head h
      b = t[:, lo + half:lo + head_dim]                   # second half
      out_ref[0, :, lo:lo + half] = (a * cos - b * sin).astype(out_ref.dtype)
      out_ref[0, :, lo + half:lo + head_dim] = (b * cos + a * sin).astype(out_ref.dtype)

  rope_store(q, q_ref)
  rope_store(k, k_ref)


# ---------------------------------------------------------------------------
# Stage 2: flash attention (online softmax over KV tiles) + O-projection.
# ---------------------------------------------------------------------------
def _flash_oproj_kernel(q_ref, k_ref, v_ref, wo_ref, o_ref,
                        acc_ref, m_ref, l_ref,
                        *, num_heads, head_dim):
  """Grid = (batch, q_block, kv_block); kv_block innermost reduction axis.
  q_ref: (1, tq, H) bf16 (RoPE'd, pre-scaled); k_ref/v_ref: (1, tk, H) bf16;
  wo_ref: (H, H) bf16 resident; o_ref: (1, tq, H) bf16;
  acc_ref: (tq, H) f32; m_ref/l_ref: (tq, num_heads) f32 (lane-packed stats)."""
  ki = pl.program_id(2)
  nk = pl.num_programs(2)

  @pl.when(ki == 0)
  def _init():
    m_ref[...] = jnp.full(m_ref.shape, -jnp.inf, jnp.float32)
    l_ref[...] = jnp.zeros(l_ref.shape, jnp.float32)
    acc_ref[...] = jnp.zeros(acc_ref.shape, jnp.float32)

  q = q_ref[0]                                            # (tq, H) bf16
  k = k_ref[0]                                            # (tk, H) bf16
  v = v_ref[0]                                            # (tk, H) bf16

  # TODO(synk): for num_heads >= 16 switch this static unroll to a
  # lax.fori_loop over heads (pl.ds(h*head_dim, head_dim)) to bound vreg live
  # ranges; static unroll is fine for small head counts.
  for h in range(num_heads):
    sl = slice(h * head_dim, (h + 1) * head_dim)
    # NT dot: contract the head dims directly, no k transpose materialized.
    s = lax.dot_general(q[:, sl], k[:, sl], (((1,), (1,)), ((), ())),
                        preferred_element_type=jnp.float32)        # (tq, tk)
    m_prev = m_ref[:, h:h + 1]                            # (tq, 1)
    l_prev = l_ref[:, h:h + 1]
    m_new = jnp.maximum(m_prev, jnp.max(s, axis=-1, keepdims=True))
    alpha = jnp.exp(m_prev - m_new)
    p = jnp.exp(s - m_new)                                # (tq, tk) f32
    l_ref[:, h:h + 1] = alpha * l_prev + jnp.sum(p, axis=-1, keepdims=True)
    m_ref[:, h:h + 1] = m_new
    acc_ref[:, sl] = alpha * acc_ref[:, sl] + lax.dot_general(
        p.astype(jnp.bfloat16), v[:, sl], (((1,), (0,)), ((), ())),
        preferred_element_type=jnp.float32)

  @pl.when(ki == nk - 1)
  def _finalize():
    for h in range(num_heads):
      sl = slice(h * head_dim, (h + 1) * head_dim)
      inv_l = pl.reciprocal(l_ref[:, h:h + 1], approx=True)   # EUP slot
      acc_ref[:, sl] = acc_ref[:, sl] * inv_l
    attn = acc_ref[...].astype(jnp.bfloat16)              # lane-dense (tq, H)
    o_ref[0] = jnp.dot(attn, wo_ref[...],
                       preferred_element_type=jnp.float32).astype(o_ref.dtype)


# ---------------------------------------------------------------------------
# Wrapper: layouts, generation-aware VMEM budgeting, two pallas_calls.
# ---------------------------------------------------------------------------
def _vmem_capacity_bytes():
  try:
    return int(pltpu.get_tpu_info().vmem_capacity_bytes)
  except Exception:
    return 64 * 1024 * 1024      # conservative fallback (v7x per-core VMEM)


def _vmem_limit(need_bytes, cap):
  # 1.5x margin over the estimated working set, clamped to [32 MiB, capacity].
  return int(min(max(int(need_bytes * 1.5), 32 * 1024 * 1024), cap))


def taos_attention(x, wq, bq, wk, bk, wv, bv, wo, cos, sin, *, num_heads,
                   block_seq=512, block_q=512, block_kv=512):
  """x: (B, S, H) f32.  Weights in PyTorch layout (out, in); biases (H,).
  cos/sin: (S, head_dim) (already indexed by position_ids = arange(S))."""
  B, S, H = x.shape
  head_dim = H // num_heads
  half = head_dim // 2
  scale = 1.0 / math.sqrt(head_dim)
  cap = _vmem_capacity_bytes()
  budget = int(cap * 0.6)

  # ---- host-side glue: layouts & dtypes ----
  x_bf = x.astype(jnp.bfloat16)
  wq_t = (wq.T * scale).astype(jnp.bfloat16)   # fold 1/sqrt(head_dim) into Q proj
  bq_s = (bq * scale)[None, :].astype(jnp.float32)
  wk_t = wk.T.astype(jnp.bfloat16)
  bk2 = bk[None, :].astype(jnp.float32)
  wv_t = wv.T.astype(jnp.bfloat16)
  bv2 = bv[None, :].astype(jnp.float32)
  wo_t = wo.T.astype(jnp.bfloat16)
  cos_h = cos[:, :half].astype(jnp.float32)    # both halves of a head share cos/sin
  sin_h = sin[:, :half].astype(jnp.float32)

  resident = pl.BlockSpec(memory_space=pltpu.MemorySpace.VMEM)

  # ------------------- stage 1: projections + RoPE -------------------
  def need1(t):
    return (3 * H * H * 2 + 6 * H * 4                      # resident weights/biases
            + 2 * (t * H * 2                               # x block (double-buffered)
                   + 2 * t * max(half, 128) * 4            # cos/sin blocks
                   + 3 * t * H * 2))                       # q/k/v output blocks

  ts = min(S, block_seq)
  while need1(ts) > budget and ts > 128:
    ts //= 2
  assert S % ts == 0  # TODO(synk): pad/mask ragged sequence tails

  q_p, k_p, v_p = pl.pallas_call(
      functools.partial(_proj_rope_kernel, num_heads=num_heads, head_dim=head_dim),
      out_shape=(jax.ShapeDtypeStruct((B, S, H), jnp.bfloat16),
                 jax.ShapeDtypeStruct((B, S, H), jnp.bfloat16),
                 jax.ShapeDtypeStruct((B, S, H), jnp.bfloat16)),
      grid_spec=pltpu.PrefetchScalarGridSpec(
          num_scalar_prefetch=0,
          grid=(B, S // ts),
          in_specs=[
              pl.BlockSpec((1, ts, H), lambda b, si: (b, si, 0)),   # x
              pl.BlockSpec((ts, half), lambda b, si: (si, 0)),      # cos (pipelined)
              pl.BlockSpec((ts, half), lambda b, si: (si, 0)),      # sin (pipelined)
              resident,   # Wq^T (pre-scaled)
              resident,   # bq   (pre-scaled)
              resident,   # Wk^T
              resident,   # bk
              resident,   # Wv^T
              resident,   # bv
          ],
          out_specs=[pl.BlockSpec((1, ts, H), lambda b, si: (b, si, 0)),
                     pl.BlockSpec((1, ts, H), lambda b, si: (b, si, 0)),
                     pl.BlockSpec((1, ts, H), lambda b, si: (b, si, 0))],
      ),
      compiler_params=pltpu.CompilerParams(
          dimension_semantics=("parallel", "parallel"),
          vmem_limit_bytes=_vmem_limit(need1(ts), cap)),
  )(x_bf, cos_h, sin_h, wq_t, bq_s, wk_t, bk2, wv_t, bv2)

  # --------------- stage 2: flash attention + O-projection ---------------
  def need2(a, b_):
    return (H * H * 2                                      # resident Wo^T
            + 2 * (a * H * 2 + 2 * b_ * H * 2 + a * H * 2)  # q,k,v,out double-buffered
            + a * H * 4 + 2 * a * 128 * 4)                 # f32 acc + stats scratch

  tq = min(S, block_q)
  tk = min(S, block_kv)
  while need2(tq, tk) > budget and max(tq, tk) > 128:
    if tk >= tq:
      tk //= 2
    else:
      tq //= 2
  assert S % tq == 0 and S % tk == 0  # TODO(synk): pad/mask ragged sequence tails

  out_bf = pl.pallas_call(
      functools.partial(_flash_oproj_kernel, num_heads=num_heads, head_dim=head_dim),
      out_shape=jax.ShapeDtypeStruct((B, S, H), jnp.bfloat16),
      grid_spec=pltpu.PrefetchScalarGridSpec(
          num_scalar_prefetch=0,
          grid=(B, S // tq, S // tk),
          in_specs=[
              pl.BlockSpec((1, tq, H), lambda b, qi, ki: (b, qi, 0)),  # Q
              pl.BlockSpec((1, tk, H), lambda b, qi, ki: (b, ki, 0)),  # K
              pl.BlockSpec((1, tk, H), lambda b, qi, ki: (b, ki, 0)),  # V
              resident,                                                # Wo^T
          ],
          out_specs=pl.BlockSpec((1, tq, H), lambda b, qi, ki: (b, qi, 0)),
          scratch_shapes=[
              pltpu.VMEM((tq, H), jnp.float32),          # output accumulator
              pltpu.VMEM((tq, num_heads), jnp.float32),  # running max (lane-packed)
              pltpu.VMEM((tq, num_heads), jnp.float32),  # running sum (lane-packed)
          ],
      ),
      compiler_params=pltpu.CompilerParams(
          dimension_semantics=("parallel", "parallel", "arbitrary"),
          vmem_limit_bytes=_vmem_limit(need2(tq, tk), cap)),
  )(q_p, k_p, v_p, wo_t)

  return out_bf.astype(x.dtype)


# ---------------------------------------------------------------------------
# Rotary cache + pure-JAX reference (mirrors the PyTorch forward).
# ---------------------------------------------------------------------------
def _rotary_cos_sin(seq_len, head_dim, base=10000.0, dtype=jnp.float32):
  """Matches TaosRotaryEmbedding cache with position_ids = arange(seq_len)."""
  inv_freq = 1.0 / (base ** (jnp.arange(0, head_dim, 2, dtype=jnp.float32)
                             / head_dim))
  t = jnp.arange(seq_len, dtype=jnp.float32)
  freqs = jnp.outer(t, inv_freq)                  # (S, hd/2)
  emb = jnp.concatenate([freqs, freqs], axis=-1)  # (S, hd)
  return jnp.cos(emb).astype(dtype), jnp.sin(emb).astype(dtype)


def _reference(x, wq, bq, wk, bk, wv, bv, wo, cos, sin, num_heads):
  B, S, H = x.shape
  hd = H // num_heads
  q = x @ wq.T + bq
  k = x @ wk.T + bk
  v = x @ wv.T + bv
  q = q.reshape(B, S, num_heads, hd).transpose(0, 2, 1, 3)
  k = k.reshape(B, S, num_heads, hd).transpose(0, 2, 1, 3)
  v = v.reshape(B, S, num_heads, hd).transpose(0, 2, 1, 3)
  c = cos[None, None]
  s = sin[None, None]
  rot = lambda t: jnp.concatenate([-t[..., hd // 2:], t[..., :hd // 2]], -1)
  q = q * c + rot(q) * s
  k = k * c + rot(k) * s
  scores = jnp.einsum("bhqd,bhkd->bhqk", q, k) / math.sqrt(hd)
  p = jax.nn.softmax(scores, axis=-1)
  o = jnp.einsum("bhqk,bhkd->bhqd", p, v)
  o = o.transpose(0, 2, 1, 3).reshape(B, S, H)
  return o @ wo.T


if __name__ == "__main__":
  B, S, H, NH = 2, 8, 32, 4
  HD = H // NH

  key = jax.random.PRNGKey(0)
  keys = jax.random.split(key, 8)
  init = 0.02
  x = jax.random.normal(keys[0], (B, S, H), dtype=jnp.float32)
  wq = init * jax.random.normal(keys[1], (H, H), dtype=jnp.float32)
  wk = init * jax.random.normal(keys[2], (H, H), dtype=jnp.float32)
  wv = init * jax.random.normal(keys[3], (H, H), dtype=jnp.float32)
  wo = init * jax.random.normal(keys[4], (H, H), dtype=jnp.float32)
  bq = init * jax.random.normal(keys[5], (H,), dtype=jnp.float32)
  bk = init * jax.random.normal(keys[6], (H,), dtype=jnp.float32)
  bv = init * jax.random.normal(keys[7], (H,), dtype=jnp.float32)

  # position_ids = arange(S); cos/sin pre-gathered (glue).
  cos, sin = _rotary_cos_sin(S, HD)

  out = taos_attention(x, wq, bq, wk, bk, wv, bv, wo, cos, sin, num_heads=NH)
  out = jax.block_until_ready(out)

  ref = _reference(x, wq, bq, wk, bk, wv, bv, wo, cos, sin, NH)
  assert out.shape == (B, S, H)
  err = float(jnp.max(jnp.abs(out - ref)))
  # bf16 MXU inputs, bf16 intermediates + approx reciprocal -> loose tolerance.
  assert err < 5e-3, err

  print("KERNEL_OK")
</pallas_src>

<mosaic_0001>
module attributes {stable_mosaic.version = 11 : i64} {
  func.func @_proj_rope_kernel(%arg0: i32, %arg1: i32, %arg2: memref<1x8x32xbf16, #tpu.memory_space<vmem>>, %arg3: memref<8x4xf32, #tpu.memory_space<vmem>>, %arg4: memref<8x4xf32, #tpu.memory_space<vmem>>, %arg5: memref<32x32xbf16, #tpu.memory_space<vmem>>, %arg6: memref<1x32xf32, #tpu.memory_space<vmem>>, %arg7: memref<32x32xbf16, #tpu.memory_space<vmem>>, %arg8: memref<1x32xf32, #tpu.memory_space<vmem>>, %arg9: memref<32x32xbf16, #tpu.memory_space<vmem>>, %arg10: memref<1x32xf32, #tpu.memory_space<vmem>>, %arg11: memref<1x8x32xbf16, #tpu.memory_space<vmem>>, %arg12: memref<1x8x32xbf16, #tpu.memory_space<vmem>>, %arg13: memref<1x8x32xbf16, #tpu.memory_space<vmem>>) attributes {dimension_semantics = [#tpu.dimension_semantics<parallel>, #tpu.dimension_semantics<parallel>], iteration_bounds = array<i64: 2, 1>, scalar_prefetch = 0 : i64, scratch_operands = 0 : i64, tpu.core_type = #tpu.core_type<tc>, window_params = [{transform_indices = @transform_0, window_bounds = array<i64: 1, 8, 32>}, {transform_indices = @transform_1, window_bounds = array<i64: 8, 4>}, {transform_indices = @transform_2, window_bounds = array<i64: 8, 4>}, {pipeline_mode = #tpu.pipeline_mode<synchronous>, transform_indices = @transform_3, window_bounds = array<i64: 32, 32>}, {pipeline_mode = #tpu.pipeline_mode<synchronous>, transform_indices = @transform_4, window_bounds = array<i64: 1, 32>}, {pipeline_mode = #tpu.pipeline_mode<synchronous>, transform_indices = @transform_5, window_bounds = array<i64: 32, 32>}, {pipeline_mode = #tpu.pipeline_mode<synchronous>, transform_indices = @transform_6, window_bounds = array<i64: 1, 32>}, {pipeline_mode = #tpu.pipeline_mode<synchronous>, transform_indices = @transform_7, window_bounds = array<i64: 32, 32>}, {pipeline_mode = #tpu.pipeline_mode<synchronous>, transform_indices = @transform_8, window_bounds = array<i64: 1, 32>}, {transform_indices = @transform_9, window_bounds = array<i64: 1, 8, 32>}, {transform_indices = @transform_10, window_bounds = array<i64: 1, 8, 32>}, {transform_indices = @transform_11, window_bounds = array<i64: 1, 8, 32>}]} {
    %c0 = arith.constant 0 : index
    %c0_0 = arith.constant 0 : index
    %c0_1 = arith.constant 0 : index
    %0 = vector.load %arg2[%c0, %c0_0, %c0_1] : memref<1x8x32xbf16, #tpu.memory_space<vmem>>, vector<1x8x32xbf16>
    %1 = vector.shape_cast %0 : vector<1x8x32xbf16> to vector<8x32xbf16>
    %c0_2 = arith.constant 0 : index
    %c0_3 = arith.constant 0 : index
    %2 = vector.load %arg3[%c0_2, %c0_3] : memref<8x4xf32, #tpu.memory_space<vmem>>, vector<8x4xf32>
    %c0_4 = arith.constant 0 : index
    %c0_5 = arith.constant 0 : index
    %3 = vector.load %arg4[%c0_4, %c0_5] : memref<8x4xf32, #tpu.memory_space<vmem>>, vector<8x4xf32>
    %c0_6 = arith.constant 0 : index
    %c0_7 = arith.constant 0 : index
    %4 = vector.load %arg5[%c0_6, %c0_7] : memref<32x32xbf16, #tpu.memory_space<vmem>>, vector<32x32xbf16>
    %cst = arith.constant dense<0.000000e+00> : vector<8x32xf32>
    %5 = tpu.matmul %1, %4, %cst {dimension_numbers = #tpu.dot_dimension_numbers<[1], [0], [0], [1], [0, 0, 1, 1], [], []>} : vector<8x32xbf16>, vector<32x32xbf16>, vector<8x32xf32> -> vector<8x32xf32>
    %c0_8 = arith.constant 0 : index
    %c0_9 = arith.constant 0 : index
    %6 = vector.load %arg6[%c0_8, %c0_9] : memref<1x32xf32, #tpu.memory_space<vmem>>, vector<1x32xf32>
    %7 = vector.broadcast %6 : vector<1x32xf32> to vector<8x32xf32>
    %8 = arith.addf %5, %7 : vector<8x32xf32>
    %c0_10 = arith.constant 0 : index
    %c0_11 = arith.constant 0 : index
    %9 = vector.load %arg7[%c0_10, %c0_11] : memref<32x32xbf16, #tpu.memory_space<vmem>>, vector<32x32xbf16>
    %cst_12 = arith.constant dense<0.000000e+00> : vector<8x32xf32>
    %10 = tpu.matmul %1, %9, %cst_12 {dimension_numbers = #tpu.dot_dimension_numbers<[1], [0], [0], [1], [0, 0, 1, 1], [], []>} : vector<8x32xbf16>, vector<32x32xbf16>, vector<8x32xf32> -> vector<8x32xf32>
    %c0_13 = arith.constant 0 : index
    %c0_14 = arith.constant 0 : index
    %11 = vector.load %arg8[%c0_13, %c0_14] : memref<1x32xf32, #tpu.memory_space<vmem>>, vector<1x32xf32>
    %12 = vector.broadcast %11 : vector<1x32xf32> to vector<8x32xf32>
    %13 = arith.addf %10, %12 : vector<8x32xf32>
    %c0_15 = arith.constant 0 : index
    %c0_16 = arith.constant 0 : index
    %14 = vector.load %arg9[%c0_15, %c0_16] : memref<32x32xbf16, #tpu.memory_space<vmem>>, vector<32x32xbf16>
    %cst_17 = arith.constant dense<0.000000e+00> : vector<8x32xf32>
    %15 = tpu.matmul %1, %14, %cst_17 {dimension_numbers = #tpu.dot_dimension_numbers<[1], [0], [0], [1], [0, 0, 1, 1], [], []>} : vector<8x32xbf16>, vector<32x32xbf16>, vector<8x32xf32> -> vector<8x32xf32>
    %c0_18 = arith.constant 0 : index
    %c0_19 = arith.constant 0 : index
    %16 = vector.load %arg10[%c0_18, %c0_19] : memref<1x32xf32, #tpu.memory_space<vmem>>, vector<1x32xf32>
    %17 = vector.broadcast %16 : vector<1x32xf32> to vector<8x32xf32>
    %18 = arith.addf %15, %17 : vector<8x32xf32>
    %19 = arith.truncf %18 : vector<8x32xf32> to vector<8x32xbf16>
    %c0_20 = arith.constant 0 : index
    %c0_21 = arith.constant 0 : index
    %c0_22 = arith.constant 0 : index
    %20 = vector.load %arg13[%c0_20, %c0_21, %c0_22] : memref<1x8x32xbf16, #tpu.memory_space<vmem>>, vector<1x8x32xbf16>
    %21 = vector.shape_cast %20 : vector<1x8x32xbf16> to vector<8x32xbf16>
    %22 = vector.shape_cast %19 : vector<8x32xbf16> to vector<1x8x32xbf16>
    tpu.vector_store %arg13[%c0_20, %c0_21, %c0_22], %22 {strides = array<i32>} : memref<1x8x32xbf16, #tpu.memory_space<vmem>>, vector<1x8x32xbf16>,
    %23 = vector.extract_strided_slice %8 {offsets = [0, 0], sizes = [8, 4], strides = [1, 1]} : vector<8x32xf32> to vector<8x4xf32>
    %24 = vector.extract_strided_slice %8 {offsets = [0, 4], sizes = [8, 4], strides = [1, 1]} : vector<8x32xf32> to vector<8x4xf32>
    %25 = arith.mulf %23, %2 : vector<8x4xf32>
    %26 = arith.mulf %24, %3 : vector<8x4xf32>
    %27 = arith.subf %25, %26 : vector<8x4xf32>
    %28 = arith.truncf %27 : vector<8x4xf32> to vector<8x4xbf16>
    %c0_23 = arith.constant 0 : index
    %c0_24 = arith.constant 0 : index
    %c0_25 = arith.constant 0 : index
    %29 = vector.load %arg11[%c0_23, %c0_24, %c0_25] : memref<1x8x32xbf16, #tpu.memory_space<vmem>>, vector<1x8x4xbf16>
    %30 = vector.shape_cast %29 : vector<1x8x4xbf16> to vector<8x4xbf16>
    %31 = vector.shape_cast %28 : vector<8x4xbf16> to vector<1x8x4xbf16>
    tpu.vector_store %arg11[%c0_23, %c0_24, %c0_25], %31 {strides = array<i32>} : memref<1x8x32xbf16, #tpu.memory_space<vmem>>, vector<1x8x4xbf16>,
    %32 = arith.mulf %24, %2 : vector<8x4xf32>
    %33 = arith.mulf %23, %3 : vector<8x4xf32>
    %34 = arith.addf %32, %33 : vector<8x4xf32>
    %35 = arith.truncf %34 : vector<8x4xf32> to vector<8x4xbf16>
    %c0_26 = arith.constant 0 : index
    %c0_27 = arith.constant 0 : index
    %c4 = arith.constant 4 : index
    %36 = vector.load %arg11[%c0_26, %c0_27, %c4] : memref<1x8x32xbf16, #tpu.memory_space<vmem>>, vector<1x8x4xbf16>
    %37 = vector.shape_cast %36 : vector<1x8x4xbf16> to vector<8x4xbf16>
    %38 = vector.shape_cast %35 : vector<8x4xbf16> to vector<1x8x4xbf16>
    tpu.vector_store %arg11[%c0_26, %c0_27, %c4], %38 {strides = array<i32>} : memref<1x8x32xbf16, #tpu.memory_space<vmem>>, vector<1x8x4xbf16>,
    %39 = vector.extract_strided_slice %8 {offsets = [0, 8], sizes = [8, 4], strides = [1, 1]} : vector<8x32xf32> to vector<8x4xf32>
    %40 = vector.extract_strided_slice %8 {offsets = [0, 12], sizes = [8, 4], strides = [1, 1]} : vector<8x32xf32> to vector<8x4xf32>
    %41 = arith.mulf %39, %2 : vector<8x4xf32>
    %42 = arith.mulf %40, %3 : vector<8x4xf32>
    %43 = arith.subf %41, %42 : vector<8x4xf32>
    %44 = arith.truncf %43 : vector<8x4xf32> to vector<8x4xbf16>
    %c0_28 = arith.constant 0 : index
    %c0_29 = arith.constant 0 : index
    %c8 = arith.constant 8 : index
    %45 = vector.load %arg11[%c0_28, %c0_29, %c8] : memref<1x8x32xbf16, #tpu.memory_space<vmem>>, vector<1x8x4xbf16>
    %46 = vector.shape_cast %45 : vector<1x8x4xbf16> to vector<8x4xbf16>
    %47 = vector.shape_cast %44 : vector<8x4xbf16> to vector<1x8x4xbf16>
    tpu.vector_store %arg11[%c0_28, %c0_29, %c8], %47 {strides = array<i32>} : memref<1x8x32xbf16, #tpu.memory_space<vmem>>, vector<1x8x4xbf16>,
    %48 = arith.mulf %40, %2 : vector<8x4xf32>
    %49 = arith.mulf %39, %3 : vector<8x4xf32>
    %50 = arith.addf %48, %49 : vector<8x4xf32>
    %51 = arith.truncf %50 : vector<8x4xf32> to vector<8x4xbf16>
    %c0_30 = arith.constant 0 : index
    %c0_31 = arith.constant 0 : index
    %c12 = arith.constant 12 : index
    %52 = vector.load %arg11[%c0_30, %c0_31, %c12] : memref<1x8x32xbf16, #tpu.memory_space<vmem>>, vector<1x8x4xbf16>
    %53 = vector.shape_cast %52 : vector<1x8x4xbf16> to vector<8x4xbf16>
    %54 = vector.shape_cast %51 : vector<8x4xbf16> to vector<1x8x4xbf16>
    tpu.vector_store %arg11[%c0_30, %c0_31, %c12], %54 {strides = array<i32>} : memref<1x8x32xbf16, #tpu.memory_space<vmem>>, vector<1x8x4xbf16>,
    %55 = vector.extract_strided_slice %8 {offsets = [0, 16], sizes = [8, 4], strides = [1, 1]} : vector<8x32xf32> to vector<8x4xf32>
    %56 = vector.extract_strided_slice %8 {offsets = [0, 20], sizes = [8, 4], strides = [1, 1]} : vector<8x32xf32> to vector<8x4xf32>
    %57 = arith.mulf %55, %2 : vector<8x4xf32>
    %58 = arith.mulf %56, %3 : vector<8x4xf32>
    %59 = arith.subf %57, %58 : vector<8x4xf32>
    %60 = arith.truncf %59 : vector<8x4xf32> to vector<8x4xbf16>
    %c0_32 = arith.constant 0 : index
    %c0_33 = arith.constant 0 : index
    %c16 = arith.constant 16 : index
    %61 = vector.load %arg11[%c0_32, %c0_33, %c16] : memref<1x8x32xbf16, #tpu.memory_space<vmem>>, vector<1x8x4xbf16>
    %62 = vector.shape_cast %61 : vector<1x8x4xbf16> to vector<8x4xbf16>
    %63 = vector.shape_cast %60 : vector<8x4xbf16> to vector<1x8x4xbf16>
    tpu.vector_store %arg11[%c0_32, %c0_33, %c16], %63 {strides = array<i32>} : memref<1x8x32xbf16, #tpu.memory_space<vmem>>, vector<1x8x4xbf16>,
    %64 = arith.mulf %56, %2 : vector<8x4xf32>
    %65 = arith.mulf %55, %3 : vector<8x4xf32>
    %66 = arith.addf %64, %65 : vector<8x4xf32>
    %67 = arith.truncf %66 : vector<8x4xf32> to vector<8x4xbf16>
    %c0_34 = arith.constant 0 : index
    %c0_35 = arith.constant 0 : index
    %c20 = arith.constant 20 : index
    %68 = vector.load %arg11[%c0_34, %c0_35, %c20] : memref<1x8x32xbf16, #tpu.memory_space<vmem>>, vector<1x8x4xbf16>
    %69 = vector.shape_cast %68 : vector<1x8x4xbf16> to vector<8x4xbf16>
    %70 = vector.shape_cast %67 : vector<8x4xbf16> to vector<1x8x4xbf16>
    tpu.vector_store %arg11[%c0_34, %c0_35, %c20], %70 {strides = array<i32>} : memref<1x8x32xbf16, #tpu.memory_space<vmem>>, vector<1x8x4xbf16>,
    %71 = vector.extract_strided_slice %8 {offsets = [0, 24], sizes = [8, 4], strides = [1, 1]} : vector<8x32xf32> to vector<8x4xf32>
    %72 = vector.extract_strided_slice %8 {offsets = [0, 28], sizes = [8, 4], strides = [1, 1]} : vector<8x32xf32> to vector<8x4xf32>
    %73 = arith.mulf %71, %2 : vector<8x4xf32>
    %74 = arith.mulf %72, %3 : vector<8x4xf32>
    %75 = arith.subf %73, %74 : vector<8x4xf32>
    %76 = arith.truncf %75 : vector<8x4xf32> to vector<8x4xbf16>
    %c0_36 = arith.constant 0 : index
    %c0_37 = arith.constant 0 : index
    %c24 = arith.constant 24 : index
    %77 = vector.load %arg11[%c0_36, %c0_37, %c24] : memref<1x8x32xbf16, #tpu.memory_space<vmem>>, vector<1x8x4xbf16>
    %78 = vector.shape_cast %77 : vector<1x8x4xbf16> to vector<8x4xbf16>
    %79 = vector.shape_cast %76 : vector<8x4xbf16> to vector<1x8x4xbf16>
    tpu.vector_store %arg11[%c0_36, %c0_37, %c24], %79 {strides = array<i32>} : memref<1x8x32xbf16, #tpu.memory_space<vmem>>, vector<1x8x4xbf16>,
    %80 = arith.mulf %72, %2 : vector<8x4xf32>
    %81 = arith.mulf %71, %3 : vector<8x4xf32>
    %82 = arith.addf %80, %81 : vector<8x4xf32>
    %83 = arith.truncf %82 : vector<8x4xf32> to vector<8x4xbf16>
    %c0_38 = arith.constant 0 : index
    %c0_39 = arith.constant 0 : index
    %c28 = arith.constant 28 : index
    %84 = vector.load %arg11[%c0_38, %c0_39, %c28] : memref<1x8x32xbf16, #tpu.memory_space<vmem>>, vector<1x8x4xbf16>
    %85 = vector.shape_cast %84 : vector<1x8x4xbf16> to vector<8x4xbf16>
    %86 = vector.shape_cast %83 : vector<8x4xbf16> to vector<1x8x4xbf16>
    tpu.vector_store %arg11[%c0_38, %c0_39, %c28], %86 {strides = array<i32>} : memref<1x8x32xbf16, #tpu.memory_space<vmem>>, vector<1x8x4xbf16>,
    %87 = vector.extract_strided_slice %13 {offsets = [0, 0], sizes = [8, 4], strides = [1, 1]} : vector<8x32xf32> to vector<8x4xf32>
    %88 = vector.extract_strided_slice %13 {offsets = [0, 4], sizes = [8, 4], strides = [1, 1]} : vector<8x32xf32> to vector<8x4xf32>
    %89 = arith.mulf %87, %2 : vector<8x4xf32>
    %90 = arith.mulf %88, %3 : vector<8x4xf32>
    %91 = arith.subf %89, %90 : vector<8x4xf32>
    %92 = arith.truncf %91 : vector<8x4xf32> to vector<8x4xbf16>
    %c0_40 = arith.constant 0 : index
    %c0_41 = arith.constant 0 : index
    %c0_42 = arith.constant 0 : index
    %93 = vector.load %arg12[%c0_40, %c0_41, %c0_42] : memref<1x8x32xbf16, #tpu.memory_space<vmem>>, vector<1x8x4xbf16>
    %94 = vector.shape_cast %93 : vector<1x8x4xbf16> to vector<8x4xbf16>
    %95 = vector.shape_cast %92 : vector<8x4xbf16> to vector<1x8x4xbf16>
    tpu.vector_store %arg12[%c0_40, %c0_41, %c0_42], %95 {strides = array<i32>} : memref<1x8x32xbf16, #tpu.memory_space<vmem>>, vector<1x8x4xbf16>,
    %96 = arith.mulf %88, %2 : vector<8x4xf32>
    %97 = arith.mulf %87, %3 : vector<8x4xf32>
    %98 = arith.addf %96, %97 : vector<8x4xf32>
    %99 = arith.truncf %98 : vector<8x4xf32> to vector<8x4xbf16>
    %c0_43 = arith.constant 0 : index
    %c0_44 = arith.constant 0 : index
    %c4_45 = arith.constant 4 : index
    %100 = vector.load %arg12[%c0_43, %c0_44, %c4_45] : memref<1x8x32xbf16, #tpu.memory_space<vmem>>, vector<1x8x4xbf16>
    %101 = vector.shape_cast %100 : vector<1x8x4xbf16> to vector<8x4xbf16>
    %102 = vector.shape_cast %99 : vector<8x4xbf16> to vector<1x8x4xbf16>
    tpu.vector_store %arg12[%c0_43, %c0_44, %c4_45], %102 {strides = array<i32>} : memref<1x8x32xbf16, #tpu.memory_space<vmem>>, vector<1x8x4xbf16>,
    %103 = vector.extract_strided_slice %13 {offsets = [0, 8], sizes = [8, 4], strides = [1, 1]} : vector<8x32xf32> to vector<8x4xf32>
    %104 = vector.extract_strided_slice %13 {offsets = [0, 12], sizes = [8, 4], strides = [1, 1]} : vector<8x32xf32> to vector<8x4xf32>
    %105 = arith.mulf %103, %2 : vector<8x4xf32>
    %106 = arith.mulf %104, %3 : vector<8x4xf32>
    %107 = arith.subf %105, %106 : vector<8x4xf32>
    %108 = arith.truncf %107 : vector<8x4xf32> to vector<8x4xbf16>
    %c0_46 = arith.constant 0 : index
    %c0_47 = arith.constant 0 : index
    %c8_48 = arith.constant 8 : index
    %109 = vector.load %arg12[%c0_46, %c0_47, %c8_48] : memref<1x8x32xbf16, #tpu.memory_space<vmem>>, vector<1x8x4xbf16>
    %110 = vector.shape_cast %109 : vector<1x8x4xbf16> to vector<8x4xbf16>
    %111 = vector.shape_cast %108 : vector<8x4xbf16> to vector<1x8x4xbf16>
    tpu.vector_store %arg12[%c0_46, %c0_47, %c8_48], %111 {strides = array<i32>} : memref<1x8x32xbf16, #tpu.memory_space<vmem>>, vector<1x8x4xbf16>,
    %112 = arith.mulf %104, %2 : vector<8x4xf32>
    %113 = arith.mulf %103, %3 : vector<8x4xf32>
    %114 = arith.addf %112, %113 : vector<8x4xf32>
    %115 = arith.truncf %114 : vector<8x4xf32> to vector<8x4xbf16>
    %c0_49 = arith.constant 0 : index
    %c0_50 = arith.constant 0 : index
    %c12_51 = arith.constant 12 : index
    %116 = vector.load %arg12[%c0_49, %c0_50, %c12_51] : memref<1x8x32xbf16, #tpu.memory_space<vmem>>, vector<1x8x4xbf16>
    %117 = vector.shape_cast %116 : vector<1x8x4xbf16> to vector<8x4xbf16>
    %118 = vector.shape_cast %115 : vector<8x4xbf16> to vector<1x8x4xbf16>
    tpu.vector_store %arg12[%c0_49, %c0_50, %c12_51], %118 {strides = array<i32>} : memref<1x8x32xbf16, #tpu.memory_space<vmem>>, vector<1x8x4xbf16>,
    %119 = vector.extract_strided_slice %13 {offsets = [0, 16], sizes = [8, 4], strides = [1, 1]} : vector<8x32xf32> to vector<8x4xf32>
    %120 = vector.extract_strided_slice %13 {offsets = [0, 20], sizes = [8, 4], strides = [1, 1]} : vector<8x32xf32> to vector<8x4xf32>
    %121 = arith.mulf %119, %2 : vector<8x4xf32>
    %122 = arith.mulf %120, %3 : vector<8x4xf32>
    %123 = arith.subf %121, %122 : vector<8x4xf32>
    %124 = arith.truncf %123 : vector<8x4xf32> to vector<8x4xbf16>
    %c0_52 = arith.constant 0 : index
    %c0_53 = arith.constant 0 : index
    %c16_54 = arith.constant 16 : index
    %125 = vector.load %arg12[%c0_52, %c0_53, %c16_54] : memref<1x8x32xbf16, #tpu.memory_space<vmem>>, vector<1x8x4xbf16>
    %126 = vector.shape_cast %125 : vector<1x8x4xbf16> to vector<8x4xbf16>
    %127 = vector.shape_cast %124 : vector<8x4xbf16> to vector<1x8x4xbf16>
    tpu.vector_store %arg12[%c0_52, %c0_53, %c16_54], %127 {strides = array<i32>} : memref<1x8x32xbf16, #tpu.memory_space<vmem>>, vector<1x8x4xbf16>,
    %128 = arith.mulf %120, %2 : vector<8x4xf32>
    %129 = arith.mulf %119, %3 : vector<8x4xf32>
    %130 = arith.addf %128, %129 : vector<8x4xf32>
    %131 = arith.truncf %130 : vector<8x4xf32> to vector<8x4xbf16>
    %c0_55 = arith.constant 0 : index
    %c0_56 = arith.constant 0 : index
    %c20_57 = arith.constant 20 : index
    %132 = vector.load %arg12[%c0_55, %c0_56, %c20_57] : memref<1x8x32xbf16, #tpu.memory_space<vmem>>, vector<1x8x4xbf16>
    %133 = vector.shape_cast %132 : vector<1x8x4xbf16> to vector<8x4xbf16>
    %134 = vector.shape_cast %131 : vector<8x4xbf16> to vector<1x8x4xbf16>
    tpu.vector_store %arg12[%c0_55, %c0_56, %c20_57], %134 {strides = array<i32>} : memref<1x8x32xbf16, #tpu.memory_space<vmem>>, vector<1x8x4xbf16>,
    %135 = vector.extract_strided_slice %13 {offsets = [0, 24], sizes = [8, 4], strides = [1, 1]} : vector<8x32xf32> to vector<8x4xf32>
    %136 = vector.extract_strided_slice %13 {offsets = [0, 28], sizes = [8, 4], strides = [1, 1]} : vector<8x32xf32> to vector<8x4xf32>
    %137 = arith.mulf %135, %2 : vector<8x4xf32>
    %138 = arith.mulf %136, %3 : vector<8x4xf32>
    %139 = arith.subf %137, %138 : vector<8x4xf32>
    %140 = arith.truncf %139 : vector<8x4xf32> to vector<8x4xbf16>
    %c0_58 = arith.constant 0 : index
    %c0_59 = arith.constant 0 : index
    %c24_60 = arith.constant 24 : index
    %141 = vector.load %arg12[%c0_58, %c0_59, %c24_60] : memref<1x8x32xbf16, #tpu.memory_space<vmem>>, vector<1x8x4xbf16>
    %142 = vector.shape_cast %141 : vector<1x8x4xbf16> to vector<8x4xbf16>
    %143 = vector.shape_cast %140 : vector<8x4xbf16> to vector<1x8x4xbf16>
    tpu.vector_store %arg12[%c0_58, %c0_59, %c24_60], %143 {strides = array<i32>} : memref<1x8x32xbf16, #tpu.memory_space<vmem>>, vector<1x8x4xbf16>,
    %144 = arith.mulf %136, %2 : vector<8x4xf32>
    %145 = arith.mulf %135, %3 : vector<8x4xf32>
    %146 = arith.addf %144, %145 : vector<8x4xf32>
    %147 = arith.truncf %146 : vector<8x4xf32> to vector<8x4xbf16>
    %c0_61 = arith.constant 0 : index
    %c0_62 = arith.constant 0 : index
    %c28_63 = arith.constant 28 : index
    %148 = vector.load %arg12[%c0_61, %c0_62, %c28_63] : memref<1x8x32xbf16, #tpu.memory_space<vmem>>, vector<1x8x4xbf16>
    %149 = vector.shape_cast %148 : vector<1x8x4xbf16> to vector<8x4xbf16>
    %150 = vector.shape_cast %147 : vector<8x4xbf16> to vector<1x8x4xbf16>
    tpu.vector_store %arg12[%c0_61, %c0_62, %c28_63], %150 {strides = array<i32>} : memref<1x8x32xbf16, #tpu.memory_space<vmem>>, vector<1x8x4xbf16>,
    return
  }
  func.func @transform_0(%arg0: i32, %arg1: i32) -> (i32, i32, i32) {
    %c0_i32 = arith.constant 0 : i32
    %c0_i32_0 = arith.constant 0 : i32
    return %arg0, %arg1, %c0_i32 : i32, i32, i32
  }
  func.func @transform_1(%arg0: i32, %arg1: i32) -> (i32, i32) {
    %c0_i32 = arith.constant 0 : i32
    %c0_i32_0 = arith.constant 0 : i32
    return %arg1, %c0_i32 : i32, i32
  }
  func.func @transform_2(%arg0: i32, %arg1: i32) -> (i32, i32) {
    %c0_i32 = arith.constant 0 : i32
    %c0_i32_0 = arith.constant 0 : i32
    return %arg1, %c0_i32 : i32, i32
  }
  func.func @transform_3(%arg0: i32, %arg1: i32) -> (i32, i32) {
    %c0_i32 = arith.constant 0 : i32
    %c0_i32_0 = arith.constant 0 : i32
    %c0_i32_1 = arith.constant 0 : i32
    return %c0_i32, %c0_i32_0 : i32, i32
  }
  func.func @transform_4(%arg0: i32, %arg1: i32) -> (i32, i32) {
    %c0_i32 = arith.constant 0 : i32
    %c0_i32_0 = arith.constant 0 : i32
    %c0_i32_1 = arith.constant 0 : i32
    return %c0_i32, %c0_i32_0 : i32, i32
  }
  func.func @transform_5(%arg0: i32, %arg1: i32) -> (i32, i32) {
    %c0_i32 = arith.constant 0 : i32
    %c0_i32_0 = arith.constant 0 : i32
    %c0_i32_1 = arith.constant 0 : i32
    return %c0_i32, %c0_i32_0 : i32, i32
  }
  func.func @transform_6(%arg0: i32, %arg1: i32) -> (i32, i32) {
    %c0_i32 = arith.constant 0 : i32
    %c0_i32_0 = arith.constant 0 : i32
    %c0_i32_1 = arith.constant 0 : i32
    return %c0_i32, %c0_i32_0 : i32, i32
  }
  func.func @transform_7(%arg0: i32, %arg1: i32) -> (i32, i32) {
    %c0_i32 = arith.constant 0 : i32
    %c0_i32_0 = arith.constant 0 : i32
    %c0_i32_1 = arith.constant 0 : i32
    return %c0_i32, %c0_i32_0 : i32, i32
  }
  func.func @transform_8(%arg0: i32, %arg1: i32) -> (i32, i32) {
    %c0_i32 = arith.constant 0 : i32
    %c0_i32_0 = arith.constant 0 : i32
    %c0_i32_1 = arith.constant 0 : i32
    return %c0_i32, %c0_i32_0 : i32, i32
  }
  func.func @transform_9(%arg0: i32, %arg1: i32) -> (i32, i32, i32) {
    %c0_i32 = arith.constant 0 : i32
    %c0_i32_0 = arith.constant 0 : i32
    return %arg0, %arg1, %c0_i32 : i32, i32, i32
  }
  func.func @transform_10(%arg0: i32, %arg1: i32) -> (i32, i32, i32) {
    %c0_i32 = arith.constant 0 : i32
    %c0_i32_0 = arith.constant 0 : i32
    return %arg0, %arg1, %c0_i32 : i32, i32, i32
  }
  func.func @transform_11(%arg0: i32, %arg1: i32) -> (i32, i32, i32) {
    %c0_i32 = arith.constant 0 : i32
    %c0_i32_0 = arith.constant 0 : i32
    return %arg0, %arg1, %c0_i32 : i32, i32, i32
  }
}

</mosaic_0001>

<bundles_post_ra>
// kernel: tpu_custom_call.1
= control target key start
LH: loop header
LB: loop body
LE: loop exit
PB: predicated region body
PF: predicated region fallthrough
CT: control target
= control target key end

     0   :  { %s1890_s0 = inlined_call_operand.hbm [shape: bf16[2,8,32], index: 0, kind: input, shape index: {}]   ;;  %s1891_s1 = inlined_call_operand.vmem [shape: f32[8,4], index: 1, kind: input, shape index: {}]   ;;  %s1892_s2 = inlined_call_operand.vmem [shape: f32[8,4], index: 2, kind: input, shape index: {}]   ;;  %s1893_s3 = inlined_call_operand.vmem [shape: bf16[32,32], index: 3, kind: input, shape index: {}]   ;;  %s1894_s4 = inlined_call_operand.vmem [shape: f32[1,32], index: 4, kind: input, shape index: {}]   ;;  %s1895_s5 = inlined_call_operand.vmem [shape: bf16[32,32], index: 5, kind: input, shape index: {}]   ;;  %s1896_s6 = inlined_call_operand.vmem [shape: f32[1,32], index: 6, kind: input, shape index: {}]   ;;  %s1897_s7 = inlined_call_operand.vmem [shape: bf16[32,32], index: 7, kind: input, shape index: {}]   ;;  %s1898_s8 = inlined_call_operand.vmem [shape: f32[1,32], index: 8, kind: input, shape index: {}]   ;;  %s1899_s9 = inlined_call_operand.hbm [shape: bf16[2,8,32], index: 9, kind: output, shape index: {0}]   ;;  %s1900_s10 = inlined_call_operand.hbm [shape: bf16[2,8,32], index: 10, kind: output, shape index: {1}]   ;;  %s1901_s11 = inlined_call_operand.hbm [shape: bf16[2,8,32], index: 11, kind: output, shape index: {2}]  }
   0x1   :  { %1907 = sst [smem:[#allocation16_spill]] %s1890_s0 }
   0x2   :  { %1908 = sst [smem:[#allocation17_spill]] %s1891_s1 }
   0x3   :  { %1909 = sst [smem:[#allocation18_spill]] %s1892_s2 }
   0x4   :  { %1910 = sst [smem:[#allocation19_spill]] %s1893_s3 }
   0x5   :  { %17 = vsyncpa [#allocation3], 0 }
   0x6   :  { %19 = vsyncpa [#allocation3 + $0x1], 0 }
   0x7   :  { %20 = vsyncpa [#allocation4], 0 }
   0x8   :  { %22 = vsyncpa [#allocation4 + $0x1], 0 }
   0x9   :  { %23 = vsyncpa [#allocation7], 0 }
   0xa   :  { %25 = vsyncpa [#allocation7 + $0x1], 0  ;;  %s1499_s17 = smov 0   ;;  %s1501_s18 = smov 0  }
   0xb   :  { %s1503_s19 = smov 0   ;;  %s1505_s20 = smov 0  }
   0xc   :  { %s1507_s21 = smov 0   ;;  %s1509_s22 = smov 0  }
   0xd LB: > { %1911 = sst [smem:[#allocation12_spill]] %s1403_s17  ;;  %s1530_s23 = sadd.s32 4294967295, %s1423_s22   ;;  %s1423_s22 = sphi %s1509_s22, %s31_s22   ;;  %s1419_s21 = sphi %s1507_s21, %s1933_s21   ;;  %s1415_s20 = sphi %s1505_s20, %s1932_s20   ;;  %s1411_s19 = sphi %s1503_s19, %s1936_s19   ;;  %s1407_s18 = sphi %s1501_s18, %s1935_s18   ;;  %s1403_s17 = sphi %s1499_s17, %s1934_s17  }
   0xe   : > { %1912 = sst [smem:[#allocation13_spill]] %s1419_s21  ;;  %s1904_s24 = sadd.s32 4294967294, %s1423_s22  }
   0xf   : > { %s43_s25 = sadd.s32 1, %s1419_s21  ;;  %s52_s26 = sadd.s32 1, %s1411_s19 }
  0x10   : > { %p45_p0 = scmp.ge.s32.totalorder %s43_s25, 2  ;;  %p59_p1 = scmp.ne.s32.totalorder %s1411_s19, %s1407_s18 }
  0x11   : > { %p60_p2 = scmp.eq.s32.totalorder %s1423_s22, 0  ;;  %p65_p3 = scmp.ne.s32.totalorder %s1407_s18, %s1403_s17 }
  0x12   : > { %s1938_s25 = smov (%p45_p0, %s43_s25), 0  ;;  %p66_p5 = scmp.eq.s32.totalorder %s1530_s23, 0 }
  0x13   : > { %1913 = sst [smem:[#allocation14_spill]] %s1938_s25  ;;  %p1542_p4 = por %p60_p2, %p59_p1 }
  0x14   : > { %s47_s28 = ssub.s32 %s1419_s21, %s1938_s25  ;;  %p269_p6 = scmp.eq.s32.totalorder %s1530_s23, 1 }
  0x15   : > { %p50_p7 = scmp.eq.s32.totalorder %s47_s28, 0  ;;  %p1550_p8 = por %p66_p5, %p65_p3 }
  0x16   : > { %p1554_p9 = por %p269_p6, %p59_p1  ;;  %p275_p10 = scmp.eq.s32.totalorder %s1904_s24, 1 }
  0x17   : > { %s1561_s12 = scalar_select %p50_p7, %s1411_s19, %s52_s26  }
  0x18   : > { %s1916_s30 = scalar_select %p1554_p9, 1, 0 }
  0x19   : > { %1917 = sst [smem:[#allocation15_spill]] %s1561_s12  ;;  %p1563_p11 = por %p275_p10, %p65_p3 }
  0x1a   : > { %p1185_p13 = scmp.lt.s32.totalorder %s1423_s22, 2  ;;  %s383_s14 = sand.u32 1, %s1411_s19  }
  0x1b   : > { %s1918_s13 = scalar_select %p1563_p11, 1, 0 }
  0x1c   : > { %s1103_s15 = sshll.u32 %s383_s14, 2  ;;  %s1104_s16 = sshll.u32 %s1419_s21, 6 }
  0x1d   : > { %s1919_s0 = sld [smem:[#allocation16_spill]]  ;;  %s387_s24 = scalar_lea.vmem [#allocation2], %s1103_s15 }
  0x1e   : > { %s395_s26 = sshll.u32 %s387_s24, 4  ;;  %p1580_p0 = pnand %p1185_p13, %p1542_p4  ;;  %s1576_s26 = int_to_ptr.vmem [resolvable:$true] %s395_s26 }
  0x1f   : > { %s384_s25 = scalar_lea.sflag [#allocation3], %s383_s14 }
  0x20   : > { %p1253_p5 = pneg %p1580_p0 }
  0x23   : > { %s1574_s17 = scalar_lea.hbm %s1919_s0, %s1104_s16  ;;  %s1256_s27 = scalar_lea.hbm %s1919_s0, 128 }
  0x24   : > { %s1251_s16 = scalar_lea.hbm %s1574_s17, 64  ;;  %p1257_p4 = scmp.lt.u32.totalorder %s1574_s17, %s1919_s0 }
  0x25   : > { %p1252_p3 = scmp.ne.s32.totalorder %s1574_s17, %s1251_s16  ;;  %p1258_p10 = scmp.lt.u32.totalorder %s1256_s27, %s1251_s16 }
  0x26   : > { %p1260_p12 = scmp.lt.u32.totalorder %s1251_s16, %s1574_s17 }
  0x27   : > { %p1254_p6 = pnand %p1253_p5, %p1252_p3  ;;  %p1259_p13 = por %p1258_p10, %p1257_p4 }
  0x29   : > { %p1255_p7 = pneg %p1254_p6  ;;  %p1261_p1 = por %p1260_p12, %p1259_p13 }
  0x2b   : > { %p1262_p2 = pnand %p1261_p1, %p1255_p7 }
  0x2d   : > { %1265 = shalt.err (!%p1262_p2)
}
  0x2e   : > { %s1266_s14 = scalar_lea.vmem %s1576_s26, 64  ;;  %s1425_s24 = smov [#allocation2]  }
  0x2f   : > { %p1267_p3 = scmp.ne.s32.totalorder %s1576_s26, %s1266_s14  ;;  %s1271_s15 = sshll.u32 %s1425_s24, 4  ;;  %s1272_s15 = int_to_ptr.vmem [resolvable:$false] %s1271_s15 }
  0x30   : > { %s1273_s21 = scalar_lea.vmem %s1272_s15, 128  ;;  %p1274_p9 = scmp.lt.s32.totalorder %s1576_s26, %s1272_s15 }
  0x31   : > { %p1269_p6 = pnand %p1267_p3, %p1253_p5  ;;  %p1275_p4 = scmp.lt.s32.totalorder %s1273_s21, %s1266_s14 }
  0x33   : > { %p1270_p11 = pneg %p1269_p6  ;;  %p1276_p10 = por %p1275_p4, %p1274_p9 }
  0x35   : > { %p1277_p12 = pnand %p1276_p10, %p1270_p11 }
  0x37   : > { %1280 = shalt.err (!%p1277_p12)
}
  0x38   : > { %1174 = dma.hbm_to_vmem [thread:$0]  (!%p1580_p0), %s1574_s17, 64, %s1576_s26, %s384_s25  }
  0x39   : > { %p1921_p1 = scmp.lt.s32.totalorder %s1423_s22, 3  ;;  %p1922_p2 = scmp.ge.s32.totalorder %s1423_s22, 1 }
  0x3b   : > { %p401_p5 = pnand %p1922_p2, %p1921_p1 }
  0x3c   : > { %s1616_s16 = sand.u32 (!%p401_p5), 1, %s1407_s18  }
  0x3d   : > { %404 = sbr.rel (%p401_p5) target bundleno = 505 (0x1f9), region = 56  ;;  %s1619_s27 = sshll.u32 (!%p401_p5), %s1616_s16, 2 }
  0x3e   : > { %s407_s28 = scalar_lea.sflag (!%p401_p5), [#allocation3], %s1616_s16  ;;  %s410_s12 = scalar_lea.vmem (!%p401_p5), [#allocation2], %s1619_s27 }
  0x44   : > { %1390 = dma.done.wait (%p1550_p8), %s407_s28, 64  }
  0x45   : > { %1392 = vsyncadd (%p1550_p8), %s407_s28, 4294967232  ;;  %v1426_v0 = vmov 0.0   ;;  %vm1427_vm0 = vmmov 0   ;;  %s1923_s3 = sld [smem:[#allocation19_spill]]  ;;  %v1246_v2 = vld [vmem:[%s1895_s5] sm:$0xff]   ;;  %v1248_v4 = vld [vmem:[%s1895_s5 + $0x8] sm:$0xff]  }
  0x46   : > { %1139 = vmatprep.subr.bf16.mxu0 %v1426_v0  ;;  %1147 = vmatprep.subr.bf16.mxu1 %v1426_v0  ;;  %s1924_s2 = sld [smem:[#allocation18_spill]]  ;;  %vm502_vm1 = vcmask 261120   ;;  %s1428_s17 = smov 8   ;;  %v476_v6 = vld [vmem:[%s410_s12] sm:$0xf]  ;;  %v1250_v8 = vld [vmem:[%s1897_s7 + $0x8] sm:$0xff]  }
  0x47   : > { %1143 = vmatprep.mubr.msk.bf16.mxu0 %vm1427_vm0, %v1426_v0  ;;  %1151 = vmatprep.mubr.msk.bf16.mxu1 %vm1427_vm0, %v1426_v0  ;;  %s1429_s26 = smov 4   ;;  %v1249_v7 = vld [vmem:[%s1897_s7] sm:$0xff]   ;;  %s1430_s24 = smov 20   ;;  %vm673_vm2 = vcmask 257024   ;;  %vm687_vm3 = vcmask 27648   ;;  %vm701_vm4 = vcmask 60448  }
  0x48   : > { %1148 = vmatpush3.bf16.msra.mxu1 %v1246_v2  ;;  %s1431_s0 = smov 12   ;;  %s1432_s12 = smov 28   ;;  %v1110_v10 = vld [vmem:[%s1894_s4] ss:$0 sm:$0xff]  ;;  %vm717_vm5 = vcmask 93248   ;;  %vm733_vm6 = vcmask 126048  }
  0x49   : > { %1149 = vmatprep.subr.bf16.mxu1 %v1426_v0  ;;  %s1433_s21 = smov 16   ;;  %s1925_s1 = sld [smem:[#allocation17_spill]]  ;;  %v1114_v11 = vld [vmem:[%s1896_s6] ss:$0 sm:$0xff]  ;;  %vm749_vm7 = vcmask 158848   ;;  %vm765_vm8 = vcmask 191648  }
  0x4a   : > { %s1434_s14 = smov 24   ;;  %v1118_v35 = vld [vmem:[%s1898_s8] ss:$0 sm:$0xff]  ;;  %vm781_vm9 = vcmask 224448   ;;  %s1125_s29 = sshll.u32 %s1415_s20, 6  ;;  %vm797_vm10 = vcmask 257248  }
  0x4b   : > { %v1245_v1 = vld [vmem:[%s1923_s3] sm:$0xff]   ;;  %v1247_v3 = vld [vmem:[%s1923_s3 + $0x8] sm:$0xff]   ;;  %p1926_p9 = scmp.ne.s32.totalorder %s1916_s30, 0 }
  0x4c   : > { %1140 = vmatpush3.bf16.msra.mxu0 %v1245_v1  ;;  %v478_v5 = vld [vmem:[%s1924_s2] sm:$0xff]  ;;  %1150 = vmatpush3.bf16.msra.mxu1 %v1248_v4 }
  0x4d   : > { %1141 = vmatprep.subr.bf16.mxu0 %v1426_v0  ;;  %723 = vrot.lane.b32.xlu1 %v478_v5, %s1428_s17 }
  0x4e   : > { %677 = vrot.lane.b32.xlu0 %v478_v5, %s1429_s26 }
  0x4f   : > { %1152 = vmatmul.mubr.msk.bf16.vlgmr.msra.gmra.mrb[0].mxu1 %vm502_vm1, %v476_v6  ;;  %v1658_v9 = vld [vmem:[%s1925_s1] sm:$0xff]  ;;  %s1782_s1 = scalar_lea.hbm %s1899_s9, %s1125_s29 }
  0x50   : > { %1142 = vmatpush3.bf16.msra.mxu0 %v1247_v3 }
  0x51   : > { %1155 = vmatprep.subr.bf16.mxu0 %v1426_v0  ;;  %739 = vrot.lane.b32.xlu1 %v478_v5, %s1430_s24 }
  0x52   : > { %707 = vrot.lane.b32.xlu0 %v478_v5, %s1431_s0 }
  0x53   : > { %1144 = vmatmul.mubr.msk.bf16.vlgmr.msra.gmra.mrb[0].mxu0 %vm502_vm1, %v476_v6 }
  0x54   : > { %1156 = vmatpush3.bf16.msra.mxu0 %v1249_v7  ;;  %1159 = vmatprep.mubr.msk.bf16.mxu0 %vm1427_vm0, %v1426_v0 }
  0x55   : > { %1157 = vmatprep.subr.bf16.mxu0 %v1426_v0  ;;  %771 = vrot.lane.b32.xlu1 %v478_v5, %s1432_s12 }
  0x56   : > { %755 = vrot.lane.b32.xlu0 %v478_v5, %s1433_s21 }
  0x58   : > { %1158 = vmatpush3.bf16.msra.mxu0 %v1250_v8 }
  0x59   : > { %690 = vrot.lane.b32.xlu1 %v1658_v9, %s1429_s26 }
  0x5a   : > { %787 = vrot.lane.b32.xlu0 %v478_v5, %s1434_s14 }
  0x5b   : > { %1160 = vmatmul.mubr.msk.bf16.vlgmr.msra.gmra.mrb[4].mxu0 %vm502_vm1, %v476_v6 }
  0x5d   : > { %719 = vrot.lane.b32.xlu1 %v1658_v9, %s1431_s0 }
  0x5e   : > { %703 = vrot.lane.b32.xlu0 %v1658_v9, %s1428_s17  ;;  %s1435_s17 = smov 124  }
  0x61   : > { %751 = vrot.lane.b32.xlu1 %v1658_v9, %s1430_s24  ;;  %s1436_s24 = smov [#allocation6]  }
  0x62   : > { %735 = vrot.lane.b32.xlu0 %v1658_v9, %s1433_s21  ;;  %s1733_s21 = scalar_lea.vmem [#allocation6], %s1619_s27  ;;  %s1285_s0 = sshll.u32 %s1436_s24, 4  ;;  %s1286_s0 = int_to_ptr.vmem [resolvable:$false] %s1285_s0 }
  0x63   : > { %s910_s15 = sshll.u32 %s1733_s21, 4  ;;  %s1287_s3 = scalar_lea.vmem %s1286_s0, 128  ;;  %s1777_s15 = int_to_ptr.vmem [resolvable:$true] %s910_s15 }
  0x64   : > { %s1281_s2 = scalar_lea.vmem %s1777_s15, 64  ;;  %p1288_p7 = scmp.lt.s32.totalorder %s1777_s15, %s1286_s0 }
  0x65   : > { %783 = vrot.lane.b32.xlu1 %v1658_v9, %s1432_s12  ;;  %s466_s12 = scalar_lea.vmem [#allocation8], %s1619_s27  ;;  %p1282_p8 = scmp.ne.s32.totalorder %s1777_s15, %s1281_s2 }
  0x66   : > { %767 = vrot.lane.b32.xlu0 %v1658_v9, %s1434_s14  ;;  %s876_s14 = sand.u32 1, %s1530_s23   ;;  %s924_s20 = sshll.u32 %s466_s12, 4  ;;  %s1793_s20 = int_to_ptr.vmem [resolvable:$true] %s924_s20 }
  0x67   : > { %p1283_p11 = pnand %p1282_p8, %p1926_p9  ;;  %p1289_p13 = scmp.lt.s32.totalorder %s1287_s3, %s1281_s2 }
  0x69   : > { %p1284_p0 = pneg %p1283_p11  ;;  %p1290_p3 = por %p1289_p13, %p1288_p7 }
  0x6b   : > { %p1291_p6 = pnand %p1290_p3, %p1284_p0 }
  0xbf   : > { %v724_v29 = vpop.permute.xlu1 %723 }
  0xc0   : > { %v678_v12 = vpop.permute.xlu0 %677 }
  0xc3   : > { %v740_v33 = vpop.permute.xlu1 %739 }
  0xc4   : > { %v708_v27 = vpop.permute.xlu0 %707 }
  0xc7   : > { %v772_v46 = vpop.permute.xlu1 %771 }
  0xc8   : > { %v756_v41 = vpop.permute.xlu0 %755 }
  0xcb   : > { %v691_v52 = vpop.permute.xlu1 %690 }
  0xcc   : > { %v788_v49 = vpop.permute.xlu0 %787 }
  0xcf   : > { %v720_v54 = vpop.permute.xlu1 %719 }
  0xd0   : > { %v704_v53 = vpop.permute.xlu0 %703 }
  0xd3   : > { %v752_v56 = vpop.permute.xlu1 %751 }
  0xd4   : > { %v736_v55 = vpop.permute.xlu0 %735 }
  0xd7   : > { %v1720_v58 = vpop.permute.xlu1 %783 }
  0xd8   : > { %v1718_v57 = vpop.permute.xlu0 %767 }
 0x122   : > { %v603_v15 = vpop.f32.mrb[0].mxu1 }
 0x123   : > { %v1678_v17 = vadd.f32 %v1114_v11, %v603_v15  ;;  %v1153_v18 = vpop.f32.mrb[1].mxu1 }
 0x124   : > { %v606_v20 = vpop.f32.mrb[2].mxu1 }
 0x125   : > { %v1154_v23 = vpop.f32.mrb[3].mxu1  ;;  %v800_v24 = vmul.f32 %v678_v12, %v1678_v17  ;;  %v809_v25 = vmul.f32 %v1678_v17, %v478_v5  ;;  %v818_v30 = vmul.f32 %v708_v27, %v1678_v17  ;;  %v827_v31 = vmul.f32 %v724_v29, %v1678_v17 }
 0x126   : > { %v540_v13 = vpop.f32.mrb[0].mxu0  ;;  %v836_v37 = vmul.f32 %v740_v33, %v1678_v17  ;;  %v845_v43 = vmul.f32 %v756_v41, %v1678_v17  ;;  %v854_v47 = vmul.f32 %v772_v46, %v1678_v17  ;;  %v863_v50 = vmul.f32 %v788_v49, %v1678_v17 }
 0x127   : > { %v1676_v14 = vadd.f32 %v1110_v10, %v540_v13  ;;  %v1145_v16 = vpop.f32.mrb[1].mxu0  ;;  %802 = vrot.lane.b32.xlu1 %v800_v24, %s1435_s17  ;;  %v799_v60 = vmul.f32 %v1678_v17, %v1658_v9  ;;  %v808_v2 = vmul.f32 %v691_v52, %v1678_v17  ;;  %v826_v20 = vmul.f32 %v720_v54, %v1678_v17 }
 0x128   : > { %v543_v19 = vpop.f32.mrb[2].mxu0 }
 0x129   : > { %v1146_v21 = vpop.f32.mrb[3].mxu0  ;;  %v680_v22 = vmul.f32 %v678_v12, %v1676_v14  ;;  %v694_v26 = vmul.f32 %v1676_v14, %v478_v5  ;;  %v710_v28 = vmul.f32 %v708_v27, %v1676_v14  ;;  %v726_v32 = vmul.f32 %v724_v29, %v1676_v14 }
 0x12a   : > { %v742_v34 = vmul.f32 %v740_v33, %v1676_v14  ;;  %v758_v44 = vmul.f32 %v756_v41, %v1676_v14  ;;  %v774_v48 = vmul.f32 %v772_v46, %v1676_v14  ;;  %v790_v51 = vmul.f32 %v788_v49, %v1676_v14 }
 0x12b   : > { %682 = vrot.lane.b32.xlu0 %v680_v22, %s1435_s17  ;;  %696 = vrot.lane.b32.xlu1 %v694_v26, %s1429_s26  ;;  %v675_v59 = vmul.f32 %v1676_v14, %v1658_v9  ;;  %v693_v4 = vmul.f32 %v691_v52, %v1676_v14  ;;  %v706_v10 = vmul.f32 %v704_v53, %v1676_v14 }
 0x12c   : > { %v817_v12 = vmul.f32 %v704_v53, %v1678_v17  ;;  %v722_v22 = vmul.f32 %v720_v54, %v1676_v14  ;;  %v786_v53 = vmul.f32 %v1720_v58, %v1676_v14 }
 0x12e   : > { %v666_v36 = vpop.f32.mrb[4].mxu0 }
 0x12f   : > { %811 = vrot.lane.b32.xlu0 %v809_v25, %s1429_s26  ;;  %820 = vrot.lane.b32.xlu1 %v818_v30, %s1435_s17  ;;  %v1161_v38 = vpop.f32.mrb[5].mxu0  ;;  %v667_v39 = vadd.f32 %v1118_v35, %v666_v36  ;;  %v835_v30 = vmul.f32 %v736_v55, %v1678_v17  ;;  %v844_v36 = vmul.f32 %v752_v56, %v1678_v17 }
 0x130   : > { %v669_v40 = vpop.f32.mrb[6].mxu0  ;;  %v754_v38 = vmul.f32 %v752_v56, %v1676_v14 }
 0x131   : > { %v1162_v42 = vpop.f32.mrb[7].mxu0  ;;  %v672_v45 = vpack.c.bf16 %v667_v39, %v667_v39 }
 0x133   : > { %712 = vrot.lane.b32.xlu0 %v710_v28, %s1435_s17  ;;  %728 = vrot.lane.b32.xlu1 %v726_v32, %s1429_s26  ;;  %674 = vst.msk [vmem:[%s466_s12] sm:$0xf] %vm673_vm2, %v672_v45  ;;  %v738_v28 = vmul.f32 %v736_v55, %v1676_v14  ;;  %v770_v45 = vmul.f32 %v1718_v57, %v1676_v14  ;;  %s1795_s12 = scalar_lea.sflag [#allocation7], %s876_s14 }
 0x137   : > { %829 = vrot.lane.b32.xlu0 %v827_v31, %s1429_s26  ;;  %838 = vrot.lane.b32.xlu1 %v836_v37, %s1435_s17 }
 0x13b   : > { %744 = vrot.lane.b32.xlu0 %v742_v34, %s1435_s17  ;;  %760 = vrot.lane.b32.xlu1 %v758_v44, %s1429_s26 }
 0x13f   : > { %847 = vrot.lane.b32.xlu0 %v845_v43, %s1429_s26  ;;  %776 = vrot.lane.b32.xlu1 %v774_v48, %s1435_s17  ;;  %v853_v43 = vmul.f32 %v1718_v57, %v1678_v17 }
 0x143   : > { %856 = vrot.lane.b32.xlu0 %v854_v47, %s1435_s17  ;;  %792 = vrot.lane.b32.xlu1 %v790_v51, %s1429_s26  ;;  %v862_v51 = vmul.f32 %v1720_v58, %v1678_v17  ;;  %s1771_s17 = scalar_lea.hbm %s1900_s10, %s1125_s29 }
 0x147   : > { %865 = vrot.lane.b32.xlu0 %v863_v50, %s1429_s26  ;;  %s1729_s26 = scalar_lea.vmem [#allocation5], %s1619_s27  ;;  %s1791_s27 = scalar_lea.hbm %s1901_s11, %s1125_s29 }
 0x148   : > { %s896_s28 = sshll.u32 %s1729_s26, 4  ;;  %s1784_s28 = int_to_ptr.vmem [resolvable:$true] %s896_s28 }
 0x199   : > { %v803_v62 = vpop.permute.xlu1 %802 }
 0x19a   : > { %v805_v0 = vsub.f32 %v799_v60, %v803_v62 }
 0x19c   : > { %v806_v3 = vpack.c.bf16 %v805_v0, %v805_v0 }
 0x19d   : > { %v683_v61 = vpop.permute.xlu0 %682  ;;  %v697_v6 = vpop.permute.xlu1 %696 }
 0x19e   : > { %v685_v63 = vsub.f32 %v675_v59, %v683_v61  ;;  %807 = vst.msk [vmem:[%s1733_s21] sm:$0xf] %vm687_vm3, %v806_v3  ;;  %v699_v8 = vadd.f32 %v697_v6, %v693_v4 }
 0x1a0   : > { %v686_v1 = vpack.c.bf16 %v685_v63, %v685_v63  ;;  %v700_v11 = vpack.c.bf16 %v699_v8, %v699_v8 }
 0x1a1   : > { %v812_v5 = vpop.permute.xlu0 %811  ;;  %v821_v15 = vpop.permute.xlu1 %820 }
 0x1a2   : > { %688 = vst.msk [vmem:[%s1729_s26] sm:$0xf] %vm687_vm3, %v686_v1  ;;  %v814_v7 = vadd.f32 %v812_v5, %v808_v2  ;;  %v823_v18 = vsub.f32 %v817_v12, %v821_v15 }
 0x1a3   : > { %702 = vst.msk [vmem:[%s1729_s26] sm:$0xf] %vm701_vm4, %v700_v11 }
 0x1a4   : > { %v815_v9 = vpack.c.bf16 %v814_v7, %v814_v7  ;;  %v824_v21 = vpack.c.bf16 %v823_v18, %v823_v18 }
 0x1a5   : > { %v713_v13 = vpop.permute.xlu0 %712  ;;  %v729_v24 = vpop.permute.xlu1 %728 }
 0x1a6   : > { %816 = vst.msk [vmem:[%s1733_s21] sm:$0xf] %vm701_vm4, %v815_v9  ;;  %v715_v16 = vsub.f32 %v706_v10, %v713_v13  ;;  %v731_v26 = vadd.f32 %v729_v24, %v722_v22 }
 0x1a7   : > { %825 = vst.msk [vmem:[%s1733_s21] sm:$0xf] %vm717_vm5, %v824_v21 }
 0x1a8   : > { %v716_v19 = vpack.c.bf16 %v715_v16, %v715_v16  ;;  %v732_v29 = vpack.c.bf16 %v731_v26, %v731_v26 }
 0x1a9   : > { %v830_v23 = vpop.permute.xlu0 %829  ;;  %v839_v32 = vpop.permute.xlu1 %838 }
 0x1aa   : > { %718 = vst.msk [vmem:[%s1729_s26] sm:$0xf] %vm717_vm5, %v716_v19  ;;  %v832_v25 = vadd.f32 %v830_v23, %v826_v20  ;;  %v841_v34 = vsub.f32 %v835_v30, %v839_v32 }
 0x1ab   : > { %734 = vst.msk [vmem:[%s1729_s26] sm:$0xf] %vm733_vm6, %v732_v29 }
 0x1ac   : > { %v833_v27 = vpack.c.bf16 %v832_v25, %v832_v25  ;;  %v842_v37 = vpack.c.bf16 %v841_v34, %v841_v34 }
 0x1ad   : > { %v745_v31 = vpop.permute.xlu0 %744  ;;  %v761_v40 = vpop.permute.xlu1 %760 }
 0x1ae   : > { %834 = vst.msk [vmem:[%s1733_s21] sm:$0xf] %vm733_vm6, %v833_v27  ;;  %v747_v33 = vsub.f32 %v738_v28, %v745_v31  ;;  %v763_v42 = vadd.f32 %v761_v40, %v754_v38 }
 0x1af   : > { %843 = vst.msk [vmem:[%s1733_s21] sm:$0xf] %vm749_vm7, %v842_v37 }
 0x1b0   : > { %v748_v35 = vpack.c.bf16 %v747_v33, %v747_v33  ;;  %v764_v46 = vpack.c.bf16 %v763_v42, %v763_v42 }
 0x1b1   : > { %v848_v39 = vpop.permute.xlu0 %847  ;;  %v777_v48 = vpop.permute.xlu1 %776 }
 0x1b2   : > { %750 = vst.msk [vmem:[%s1729_s26] sm:$0xf] %vm749_vm7, %v748_v35  ;;  %v850_v41 = vadd.f32 %v848_v39, %v844_v36  ;;  %v779_v50 = vsub.f32 %v770_v45, %v777_v48 }
 0x1b3   : > { %766 = vst.msk [vmem:[%s1729_s26] sm:$0xf] %vm765_vm8, %v764_v46 }
 0x1b4   : > { %v851_v44 = vpack.c.bf16 %v850_v41, %v850_v41  ;;  %v780_v54 = vpack.c.bf16 %v779_v50, %v779_v50 }
 0x1b5   : > { %v857_v47 = vpop.permute.xlu0 %856  ;;  %v793_v56 = vpop.permute.xlu1 %792 }
 0x1b6   : > { %852 = vst.msk [vmem:[%s1733_s21] sm:$0xf] %vm765_vm8, %v851_v44  ;;  %v859_v49 = vsub.f32 %v853_v43, %v857_v47  ;;  %v795_v59 = vadd.f32 %v793_v56, %v786_v53 }
 0x1b7   : > { %782 = vst.msk [vmem:[%s1729_s26] sm:$0xf] %vm781_vm9, %v780_v54 }
 0x1b8   : > { %v860_v52 = vpack.c.bf16 %v859_v49, %v859_v49  ;;  %v796_v17 = vpack.c.bf16 %v795_v59, %v795_v59 }
 0x1b9   : > { %v866_v55 = vpop.permute.xlu0 %865 }
 0x1ba   : > { %v868_v57 = vadd.f32 %v866_v55, %v862_v51  ;;  %861 = vst.msk [vmem:[%s1733_s21] sm:$0xf] %vm781_vm9, %v860_v52 }
 0x1bc   : > { %v869_v14 = vpack.c.bf16 %v868_v57, %v868_v57 }
 0x1be   : > { %870 = vst.msk [vmem:[%s1733_s21] sm:$0xf] %vm797_vm10, %v869_v14 }
 0x1bf   : > { %1294 = shalt.err (!%p1291_p6)
}
 0x1c0   : > { %s1295_s21 = scalar_lea.hbm %s1771_s17, 64  ;;  %s1299_s23 = scalar_lea.hbm %s1900_s10, 128 }
 0x1c1   : > { %p1296_p4 = scmp.ne.s32.totalorder %s1771_s17, %s1295_s21  ;;  %p1300_p1 = scmp.lt.u32.totalorder %s1771_s17, %s1900_s10 }
 0x1c2   : > { %p1301_p2 = scmp.lt.u32.totalorder %s1299_s23, %s1295_s21  ;;  %p1303_p8 = scmp.lt.u32.totalorder %s1295_s21, %s1771_s17 }
 0x1c3   : > { %p1297_p10 = pnand %p1296_p4, %p1926_p9 }
 0x1c4   : > { %p1302_p5 = por %p1301_p2, %p1300_p1 }
 0x1c5   : > { %p1298_p12 = pneg %p1297_p10 }
 0x1c6   : > { %p1304_p11 = por %p1303_p8, %p1302_p5 }
 0x1c8   : > { %p1305_p0 = pnand %p1304_p11, %p1298_p12 }
 0x1ca   : > { %1308 = shalt.err (!%p1305_p0)
}
 0x1cb   : > { %1166 = dma.vmem_to_hbm [thread:$0]  (%p1926_p9), %s1777_s15, 64, %s1771_s17, %s1795_s12   ;;  %798 = vst.msk [vmem:[%s1729_s26] sm:$0xf] %vm797_vm10, %v796_v17 }
 0x1cc   : > { %s872_s2 = scalar_lea.sflag [#allocation4], %s1616_s16  ;;  %s1309_s3 = scalar_lea.vmem %s1784_s28, 64 }
 0x1cd   : > { %p1310_p7 = scmp.ne.s32.totalorder %s1784_s28, %s1309_s3  ;;  %s1437_s0 = smov [#allocation5]  }
 0x1ce   : > { %s1313_s21 = sshll.u32 %s1437_s0, 4  ;;  %s1314_s21 = int_to_ptr.vmem [resolvable:$false] %s1313_s21 }
 0x1cf   : > { %p1311_p13 = pnand %p1310_p7, %p1926_p9  ;;  %s1315_s14 = scalar_lea.vmem %s1314_s21, 128 }
 0x1d0   : > { %p1316_p6 = scmp.lt.s32.totalorder %s1784_s28, %s1314_s21  ;;  %p1317_p4 = scmp.lt.s32.totalorder %s1315_s14, %s1309_s3 }
 0x1d1   : > { %p1312_p3 = pneg %p1311_p13 }
 0x1d2   : > { %p1318_p10 = por %p1317_p4, %p1316_p6 }
 0x1d4   : > { %p1319_p12 = pnand %p1318_p10, %p1312_p3 }
 0x1d6   : > { %1322 = shalt.err (!%p1319_p12)
}
 0x1d7   : > { %s1323_s16 = scalar_lea.hbm %s1782_s1, 64  ;;  %s1327_s17 = scalar_lea.hbm %s1899_s9, 128 }
 0x1d8   : > { %p1324_p1 = scmp.ne.s32.totalorder %s1782_s1, %s1323_s16  ;;  %p1328_p8 = scmp.lt.u32.totalorder %s1782_s1, %s1899_s9 }
 0x1d9   : > { %p1329_p11 = scmp.lt.u32.totalorder %s1327_s17, %s1323_s16  ;;  %p1331_p7 = scmp.lt.u32.totalorder %s1323_s16, %s1782_s1 }
 0x1da   : > { %p1325_p2 = pnand %p1324_p1, %p1926_p9 }
 0x1db   : > { %p1330_p0 = por %p1329_p11, %p1328_p8 }
 0x1dc   : > { %p1326_p5 = pneg %p1325_p2 }
 0x1dd   : > { %p1332_p13 = por %p1331_p7, %p1330_p0 }
 0x1df   : > { %p1333_p3 = pnand %p1332_p13, %p1326_p5 }
 0x1e1   : > { %1336 = shalt.err (!%p1333_p3)
}
 0x1e2   : > { %1165 = dma.vmem_to_hbm [thread:$0]  (%p1926_p9), %s1784_s28, 64, %s1782_s1, %s872_s2  }
 0x1e3   : > { %s1337_s25 = scalar_lea.vmem %s1793_s20, 64  ;;  %s1438_s24 = smov [#allocation8]  }
 0x1e4   : > { %p1338_p6 = scmp.ne.s32.totalorder %s1793_s20, %s1337_s25  ;;  %s1341_s3 = sshll.u32 %s1438_s24, 4  ;;  %s1342_s3 = int_to_ptr.vmem [resolvable:$false] %s1341_s3 }
 0x1e5   : > { %s1343_s0 = scalar_lea.vmem %s1342_s3, 128  ;;  %p1344_p12 = scmp.lt.s32.totalorder %s1793_s20, %s1342_s3 }
 0x1e6   : > { %p1339_p4 = pnand %p1338_p6, %p1926_p9  ;;  %p1345_p1 = scmp.lt.s32.totalorder %s1343_s0, %s1337_s25 }
 0x1e8   : > { %p1340_p10 = pneg %p1339_p4  ;;  %p1346_p2 = por %p1345_p1, %p1344_p12 }
 0x1ea   : > { %p1347_p5 = pnand %p1346_p2, %p1340_p10 }
 0x1ec   : > { %1350 = shalt.err (!%p1347_p5)
}
 0x1ed   : > { %s1351_s1 = scalar_lea.hbm %s1791_s27, 64  ;;  %s1355_s21 = scalar_lea.hbm %s1901_s11, 128 }
 0x1ee   : > { %p1352_p8 = scmp.ne.s32.totalorder %s1791_s27, %s1351_s1  ;;  %p1356_p7 = scmp.lt.u32.totalorder %s1791_s27, %s1901_s11 }
 0x1ef   : > { %p1357_p13 = scmp.lt.u32.totalorder %s1355_s21, %s1351_s1  ;;  %p1359_p6 = scmp.lt.u32.totalorder %s1351_s1, %s1791_s27 }
 0x1f0   : > { %p1353_p11 = pnand %p1352_p8, %p1926_p9 }
 0x1f1   : > { %p1358_p3 = por %p1357_p13, %p1356_p7 }
 0x1f2   : > { %p1354_p0 = pneg %p1353_p11 }
 0x1f3   : > { %p1360_p4 = por %p1359_p6, %p1358_p3 }
 0x1f5   : > { %p1361_p10 = pnand %p1360_p4, %p1354_p0 }
 0x1f7   : > { %1364 = shalt.err (!%p1361_p10)
}
 0x1f8   : > { %1167 = dma.vmem_to_hbm [thread:$0]  (%p1926_p9), %s1793_s20, 64, %s1791_s27, %s1795_s12  }
 0x1f9 PF: > { %s1927_s26 = sld [smem:[#allocation12_spill]]  ;;  %p1928_p12 = scmp.ne.s32.totalorder %s1918_s13, 0 }
 0x1fa   : > { %p1929_p1 = scmp.ge.s32.totalorder %s1423_s22, 2 }
 0x1fc   : > { %p1176_p2 = pnand %p1929_p1, %p1928_p12 }
 0x1ff   : > { %s936_s15 = sand.u32 1, %s1927_s26  }
 0x200   : > { %s937_s17 = scalar_lea.sflag [#allocation4], %s936_s15 }
 0x201   : > { %1394 = dma.done.wait (!%p1176_p2), %s937_s17, 64  }
 0x202   : > { %1396 = vsyncadd (!%p1176_p2), %s937_s17, 4294967232  ;;  %s1930_s29 = sadd.s32 4294967294, %s1423_s22  }
 0x203   : > { %s945_s23 = sand.u32 1, %s1930_s29  }
 0x204   : > { %s946_s25 = scalar_lea.sflag [#allocation7], %s945_s23 }
 0x205   : > { %1398 = dma.done.wait (!%p1176_p2), %s946_s25, 128  }
 0x206   : > { %1400 = vsyncadd (!%p1176_p2), %s946_s25, 4294967168  ;;  %s31_s22 = sadd.s32 1, %s1423_s22   ;;  %s1931_s30 = sld [smem:[#allocation15_spill]] }
 0x207   : > { %p28_p9 = scmp.ge.s32.totalorder %s31_s22, 4   ;;  %s1932_s20 = sld [smem:[#allocation13_spill]] }
 0x208   : > { %s1933_s21 = sld [smem:[#allocation14_spill]]  ;;  %s1934_s17 = smov %s1407_s18 }
 0x209   : > { %s1935_s18 = smov %s1411_s19  ;;  %30 = sbr.rel (!%p28_p9) target bundleno = 13 (0xd), region = 139 }
 0x20c   : > { %s1936_s19 = smov %s1931_s30 }
 0x210   :  { %960 = vsyncpa [#allocation3], 1 }
 0x211   :  { %962 = vsyncpa [#allocation3 + $0x1], 1 }
 0x212   :  { %963 = vsyncpa [#allocation4], 1 }
 0x213   :  { %965 = vsyncpa [#allocation4 + $0x1], 1 }
 0x214   :  { %966 = vsyncpa [#allocation7], 1 }
 0x215   :  { %968 = vsyncpa [#allocation7 + $0x1], 1 }

</bundles_post_ra>
